<compile_context>
chip_gen: v7x
topology: tpu7x:2x2x1
jax: 0.10.0
libtpu: 0.0.40
codegen_flags: <defaults>
</compile_context>

<pallas_src>
import functools
import itertools

import jax
import jax.numpy as jnp
from jax.experimental import pallas as pl
from jax.experimental.pallas import tpu as pltpu

FOCAL_ALPHA = 0.25
FOCAL_GAMMA = 2.0
COST_CLASS_W = 2.0
COST_BBOX_W = 5.0
COST_GIOU_W = 2.0
EPS = 1e-8
PAD_LOGIT = -30.0   # class-dim pad: sigmoid ~ 1e-13 -> focal terms underflow to 0


# ----------------------------------------------------------------------------
# helpers
# ----------------------------------------------------------------------------
def _softplus(x):
    """Stable log(1+exp(x)) == -log(1 - sigmoid(x)) == BCE-with-logits (t=0)."""
    return jnp.maximum(x, 0.0) + jnp.log(1.0 + jnp.exp(-jnp.abs(x)))


@functools.lru_cache(maxsize=None)
def _vmem_caps():
    """(block-picking budget, Mosaic scoped-VMEM limit), generation-aware."""
    cap = 64 * 1024 * 1024                      # v7x-safe fallback (64 MiB physical)
    try:
        info = pltpu.get_tpu_info()
        c = getattr(info, "vmem_capacity_bytes", None)
        if c:
            cap = int(c)
    except Exception:
        pass
    budget = max(8 * 1024 * 1024, min(int(cap * 0.40), 48 * 1024 * 1024))
    limit = max(budget + (4 << 20), min(int(cap * 0.60), 96 * 1024 * 1024))
    return budget, limit


def _pick_batch_block(batch, bytes_per_batch, budget):
    """Largest divisor of `batch`, capped at batch//2 (>=2 grid steps so the
    'parallel' axis can shard across v7x's 2 TCs), whose double-buffered
    working set fits the VMEM budget."""
    cap = max(1, batch // 2)
    best = 1
    for bb in range(1, cap + 1):
        if batch % bb == 0 and 2 * bb * bytes_per_batch <= budget:
            best = bb
    return best


# ----------------------------------------------------------------------------
# Kernel 1: matcher cost matrix  C[b, q, t]   (classes padded to Cp=128 lanes,
# targets padded to Tp=128 lanes -> lane-dense loads/stores)
# ----------------------------------------------------------------------------
def _matcher_cost_kernel(logits_ref, pbox_ref, labels_ref, tboxt_ref, cost_ref):
    logits = logits_ref[...]                                  # [BB, Q, Cp] f32
    BB, Q, Cp = logits.shape
    Tp = cost_ref.shape[-1]

    # focal-style class cost, softplus/log-sigmoid form (f32 elementwise: v5e VPU)
    prob = jax.nn.sigmoid(logits)
    sp_pos = _softplus(logits)                                # -log(1 - p)
    sp_neg = _softplus(-logits)                               # -log(p)
    one_m_p = 1.0 - prob
    neg_cost = (1.0 - FOCAL_ALPHA) * (prob * prob) * sp_pos
    pos_cost = FOCAL_ALPHA * (one_m_p * one_m_p) * sp_neg
    cls_cost = (pos_cost - neg_cost).astype(jnp.bfloat16)     # bf16 MXU operand

    labels = labels_ref[...]                                  # [BB, 1, Tp] int32 (-1 = pad)
    onehot_ct = (jax.lax.broadcasted_iota(jnp.int32, (BB, Cp, Tp), 1)
                 == labels).astype(jnp.bfloat16)              # exact 0/1
    cost_class = jnp.einsum("bqc,bct->bqt", cls_cost, onehot_ct,
                            preferred_element_type=jnp.float32)   # [BB, Q, Tp] f32 acc

    pb = pbox_ref[...]                                        # [BB, Q, 4]
    tbt = tboxt_ref[...]                                      # [BB, 4, Tp]
    shape_bqt = (BB, Q, Tp)

    def bq(x):   # hoisted lane broadcast    [BB, Q, 1] -> [BB, Q, Tp]
        return jnp.broadcast_to(x, shape_bqt)

    def bt(x):   # hoisted sublane broadcast [BB, 1, Tp] -> [BB, Q, Tp]
        return jnp.broadcast_to(x, shape_bqt)

    # pairwise L1 (cdist, p=1)
    cost_bbox = jnp.zeros(shape_bqt, jnp.float32)
    for k in range(4):
        cost_bbox = cost_bbox + jnp.abs(bq(pb[:, :, k:k + 1]) - bt(tbt[:, k:k + 1, :]))

    # pairwise GIoU (cxcywh -> xyxy); per-query / per-target terms broadcast once
    px0 = bq(pb[:, :, 0:1] - 0.5 * pb[:, :, 2:3])
    py0 = bq(pb[:, :, 1:2] - 0.5 * pb[:, :, 3:4])
    px1 = bq(pb[:, :, 0:1] + 0.5 * pb[:, :, 2:3])
    py1 = bq(pb[:, :, 1:2] + 0.5 * pb[:, :, 3:4])
    tx0 = bt(tbt[:, 0:1, :] - 0.5 * tbt[:, 2:3, :])
    ty0 = bt(tbt[:, 1:2, :] - 0.5 * tbt[:, 3:4, :])
    tx1 = bt(tbt[:, 0:1, :] + 0.5 * tbt[:, 2:3, :])
    ty1 = bt(tbt[:, 1:2, :] + 0.5 * tbt[:, 3:4, :])

    area_p = (px1 - px0) * (py1 - py0)
    area_t = (tx1 - tx0) * (ty1 - ty0)
    inter_w = jnp.maximum(jnp.minimum(px1, tx1) - jnp.maximum(px0, tx0), 0.0)
    inter_h = jnp.maximum(jnp.minimum(py1, ty1) - jnp.maximum(py0, ty0), 0.0)
    inter = inter_w * inter_h
    union = area_p + area_t - inter
    iou = inter * pl.reciprocal(union + EPS, approx=True)     # matcher only -> approx OK
    enc_w = jnp.maximum(px1, tx1) - jnp.minimum(px0, tx0)
    enc_h = jnp.maximum(py1, ty1) - jnp.minimum(py0, ty0)
    area_c = enc_w * enc_h
    giou = iou - (area_c - union) * pl.reciprocal(area_c + EPS, approx=True)

    cost = COST_BBOX_W * cost_bbox + COST_CLASS_W * cost_class + COST_GIOU_W * (-giou)
    # NOTE: padded target columns hold garbage; the wrapper slices [:, :, :T]
    # before the assignment, so no pad-mask select is spent here.
    cost_ref[...] = cost.astype(cost_ref.dtype)


def matcher_cost(logits_pad, pred_boxes, labels_pad, tboxes_t_pad):
    B, Q, Cp = logits_pad.shape
    Tp = tboxes_t_pad.shape[-1]
    budget, vmem_limit = _vmem_caps()
    io_bytes = 4 * (Q * Cp + Q * 4 + Tp + 4 * Tp + Q * Tp)
    # ~14 live [Q,Tp] f32 temporaries (corners, areas, inter/union/iou/enc/giou,
    # cost accum) + a few [Q,Cp] / [Cp,Tp] passes -> count them for the block pick.
    tmp_bytes = 4 * (14 * Q * Tp + 5 * Q * Cp + 2 * Cp * Tp)
    BB = _pick_batch_block(B, io_bytes + tmp_bytes, budget)
    return pl.pallas_call(
        _matcher_cost_kernel,
        out_shape=jax.ShapeDtypeStruct((B, Q, Tp), jnp.float32),
        grid=(B // BB,),
        in_specs=[
            pl.BlockSpec((BB, Q, Cp), lambda b: (b, 0, 0)),
            pl.BlockSpec((BB, Q, 4), lambda b: (b, 0, 0)),
            pl.BlockSpec((BB, 1, Tp), lambda b: (b, 0, 0)),
            pl.BlockSpec((BB, 4, Tp), lambda b: (b, 0, 0)),
        ],
        out_specs=pl.BlockSpec((BB, Q, Tp), lambda b: (b, 0, 0)),
        compiler_params=pltpu.CompilerParams(
            dimension_semantics=("parallel",),
            vmem_limit_bytes=vmem_limit),
    )(logits_pad, pred_boxes, labels_pad, tboxes_t_pad)


# ----------------------------------------------------------------------------
# Kernel 2 (fused, batch-blocked): focal sum + cardinality error + matched-pair
# top-1 / L1 / GIoU reductions -> per-block lane-dense partials, summed in JAX.
# lanes 0..4 of row 0: [focal_sum, sum|card_err|, #top1-correct, L1 sum, giou-loss sum]
# ----------------------------------------------------------------------------
def _fused_loss_kernel(tgt_len_ref, logits_ref, mlog_ref, mpack_ref, out_ref,
                       *, num_classes):
    blk = pl.program_id(0)
    C = num_classes

    logits = logits_ref[...]                                  # [BB, Q, Cp] f32
    BB, Q, Cp = logits.shape

    # ---- sigmoid focal loss: all-negative (background) term over every cell ----
    # (padded class lanes sit at PAD_LOGIT -> their contribution underflows to 0)
    prob = jax.nn.sigmoid(logits)
    focal = jnp.sum((1.0 - FOCAL_ALPHA) * (prob * prob) * _softplus(logits))

    # ---- cardinality: per-image #(argmax != C-1), |.| vs target length ----
    lane_q = jax.lax.broadcasted_iota(jnp.int32, (BB, Q, Cp), 2)
    fg_max = jnp.max(jnp.where(lane_q < C - 1, logits, -jnp.inf), axis=-1, keepdims=True)
    noobj = jnp.sum(jnp.where(lane_q == C - 1, logits, 0.0), axis=-1, keepdims=True)
    card_pred = jnp.sum((fg_max >= noobj).astype(jnp.float32), axis=1)     # [BB, 1]
    sub = jax.lax.broadcasted_iota(jnp.int32, (BB, 1), 0)
    tl_vec = jnp.zeros((BB, 1), jnp.float32)
    for i in range(BB):                                       # BB static, small
        tl_i = tgt_len_ref[blk * BB + i].astype(jnp.float32)
        tl_vec = jnp.where(sub == i, tl_i, tl_vec)
    card = jnp.sum(jnp.abs(card_pred - tl_vec))

    # ---- matched pairs ----
    mlog = mlog_ref[...]                                      # [BB, T, Cp] f32
    pack = mpack_ref[...]                                     # [BB, T, 9] f32
    T = mlog.shape[1]
    sb = pack[:, :, 0:4]                                      # matched pred boxes
    tb = pack[:, :, 4:8]                                      # target boxes
    mlab = pack[:, :, 8:9].astype(jnp.int32)                  # [BB, T, 1] labels

    lane_t = jax.lax.broadcasted_iota(jnp.int32, (BB, T, Cp), 2)
    lab1h = (lane_t == mlab).astype(jnp.float32)
    x_lab = jnp.sum(mlog * lab1h, axis=-1, keepdims=True)     # matched logit @ label

    # top-1 correct count (real classes only; ties counted correct)
    row_max = jnp.max(jnp.where(lane_t < C, mlog, -jnp.inf), axis=-1, keepdims=True)
    top1 = jnp.sum((x_lab >= row_max).astype(jnp.float32))

    # focal positive correction at the matched (query,label) cells
    p_lab = jax.nn.sigmoid(x_lab)
    one_m_p = 1.0 - p_lab
    pos_term = FOCAL_ALPHA * (one_m_p * one_m_p) * _softplus(-x_lab)
    neg_term = (1.0 - FOCAL_ALPHA) * (p_lab * p_lab) * _softplus(x_lab)
    focal = focal + jnp.sum(pos_term - neg_term)

    # L1 + GIoU on matched boxes (exact divisions in the reported loss path)
    l1 = jnp.sum(jnp.abs(sb - tb))
    sx0 = sb[:, :, 0:1] - 0.5 * sb[:, :, 2:3]
    sy0 = sb[:, :, 1:2] - 0.5 * sb[:, :, 3:4]
    sx1 = sb[:, :, 0:1] + 0.5 * sb[:, :, 2:3]
    sy1 = sb[:, :, 1:2] + 0.5 * sb[:, :, 3:4]
    tx0 = tb[:, :, 0:1] - 0.5 * tb[:, :, 2:3]
    ty0 = tb[:, :, 1:2] - 0.5 * tb[:, :, 3:4]
    tx1 = tb[:, :, 0:1] + 0.5 * tb[:, :, 2:3]
    ty1 = tb[:, :, 1:2] + 0.5 * tb[:, :, 3:4]
    area_s = (sx1 - sx0) * (sy1 - sy0)
    area_t = (tx1 - tx0) * (ty1 - ty0)
    inter = (jnp.maximum(jnp.minimum(sx1, tx1) - jnp.maximum(sx0, tx0), 0.0) *
             jnp.maximum(jnp.minimum(sy1, ty1) - jnp.maximum(sy0, ty0), 0.0))
    union = area_s + area_t - inter
    iou = inter / (union + EPS)
    area_c = ((jnp.maximum(sx1, tx1) - jnp.minimum(sx0, tx0)) *
              (jnp.maximum(sy1, ty1) - jnp.minimum(sy0, ty0)))
    giou = iou - (area_c - union) / (area_c + EPS)
    giou_loss = jnp.sum(1.0 - giou)

    # lane-dense per-block partials (replicated across sublanes; JAX reads row 0)
    lane_o = jax.lax.broadcasted_iota(jnp.int32, (1, 8, 128), 2)
    vals = jnp.where(lane_o == 0, focal,
           jnp.where(lane_o == 1, card,
           jnp.where(lane_o == 2, top1,
           jnp.where(lane_o == 3, l1,
           jnp.where(lane_o == 4, giou_loss, 0.0)))))
    out_ref[...] = vals


def fused_losses(tgt_len, logits_pad, matched_logits, matched_packed, num_classes):
    B, Q, Cp = logits_pad.shape
    T, P = matched_packed.shape[1], matched_packed.shape[2]
    budget, vmem_limit = _vmem_caps()
    io_bytes = 4 * (Q * Cp + T * Cp + T * P + 8 * 128)
    tmp_bytes = 4 * (6 * Q * Cp + 8 * T * Cp)
    BB = _pick_batch_block(B, io_bytes + tmp_bytes, budget)
    NB = B // BB
    kernel = functools.partial(_fused_loss_kernel, num_classes=num_classes)
    partials = pl.pallas_call(
        kernel,
        out_shape=jax.ShapeDtypeStruct((NB, 8, 128), jnp.float32),
        grid_spec=pltpu.PrefetchScalarGridSpec(
            num_scalar_prefetch=1,
            grid=(NB,),
            in_specs=[
                pl.BlockSpec((BB, Q, Cp), lambda b, tl: (b, 0, 0)),
                pl.BlockSpec((BB, T, Cp), lambda b, tl: (b, 0, 0)),
                pl.BlockSpec((BB, T, P), lambda b, tl: (b, 0, 0)),
            ],
            out_specs=pl.BlockSpec((1, 8, 128), lambda b, tl: (b, 0, 0)),
        ),
        compiler_params=pltpu.CompilerParams(
            dimension_semantics=("parallel",),
            vmem_limit_bytes=vmem_limit),
    )(tgt_len, logits_pad, matched_logits, matched_packed)
    return jnp.sum(partials[:, 0, :], axis=0)     # [128]; lanes 0..4 hold the sums


# ----------------------------------------------------------------------------
# Glue: SetCriterion.forward (losses = ['labels', 'cardinality', 'boxes'])
# ----------------------------------------------------------------------------
def set_criterion_forward(pred_logits, pred_boxes, tgt_labels, tgt_boxes, num_classes):
    B, Q, C = pred_logits.shape
    assert C == num_classes
    T = tgt_labels.shape[1]
    assert T <= Q
    num_boxes = float(max(B * T, 1))          # clamp(min=1), world_size == 1

    # lane-dense paddings shared by both kernels
    Cp = ((C + 127) // 128) * 128
    Tp = ((T + 127) // 128) * 128
    logits_pad = jnp.pad(pred_logits.astype(jnp.float32),
                         ((0, 0), (0, 0), (0, Cp - C)), constant_values=PAD_LOGIT)
    labels_pad = jnp.full((B, 1, Tp), -1, dtype=jnp.int32)
    labels_pad = labels_pad.at[:, 0, :T].set(tgt_labels.astype(jnp.int32))
    tboxes_t_pad = jnp.zeros((B, 4, Tp), dtype=jnp.float32)
    tboxes_t_pad = tboxes_t_pad.at[:, :, :T].set(
        jnp.transpose(tgt_boxes.astype(jnp.float32), (0, 2, 1)))

    cost = matcher_cost(logits_pad, pred_boxes.astype(jnp.float32),
                        labels_pad, tboxes_t_pad)[:, :, :T]            # [B, Q, T]

    # exact linear-sum assignment by enumerating injective maps (small Q, T only)
    perms = jnp.asarray(list(itertools.permutations(range(Q), T)), dtype=jnp.int32)

    def assign(cost_b):
        gathered = cost_b[perms, jnp.arange(T)[None, :]]               # [P, T]
        return perms[jnp.argmin(jnp.sum(gathered, axis=-1))]           # [T]

    src_idx = jax.vmap(assign)(cost)                                   # [B, T]

    batch_ids = jnp.repeat(jnp.arange(B, dtype=jnp.int32), T)
    flat_src = src_idx.reshape(-1)

    # matched gathers (done in JAX; data-dependent gather) + packed per-pair data
    matched_logits = logits_pad[batch_ids, flat_src].reshape(B, T, Cp)
    matched_src_boxes = pred_boxes[batch_ids, flat_src].reshape(B, T, 4).astype(jnp.float32)
    matched_packed = jnp.concatenate(
        [matched_src_boxes, tgt_boxes.astype(jnp.float32),
         tgt_labels.astype(jnp.float32)[..., None]], axis=-1)          # [B, T, 9]

    tgt_len = jnp.full((B,), T, dtype=jnp.int32)

    acc = fused_losses(tgt_len, logits_pad, matched_logits, matched_packed, num_classes)

    M = B * T
    return {
        "loss_ce": acc[0] / num_boxes,              # == sigmoid_focal_loss(...) * Q
        "class_error": 100.0 - 100.0 * acc[2] / M,
        "cardinality_error": acc[1] / B,
        "loss_bbox": acc[3] / num_boxes,
        "loss_giou": acc[4] / num_boxes,
    }


if __name__ == "__main__":
    key = jax.random.PRNGKey(0)
    B, Q, C, T = 2, 8, 4, 3
    k1, k2, k3, k4, k5, k6 = jax.random.split(key, 6)

    pred_logits = jax.random.normal(k1, (B, Q, C), dtype=jnp.float32)
    p_cxcy = jax.random.uniform(k2, (B, Q, 2), minval=0.25, maxval=0.75)
    p_wh = jax.random.uniform(k3, (B, Q, 2), minval=0.1, maxval=0.4)
    pred_boxes = jnp.concatenate([p_cxcy, p_wh], axis=-1).astype(jnp.float32)

    tgt_labels = jax.random.randint(k4, (B, T), 0, C).astype(jnp.int32)
    t_cxcy = jax.random.uniform(k5, (B, T, 2), minval=0.25, maxval=0.75)
    t_wh = jax.random.uniform(k6, (B, T, 2), minval=0.1, maxval=0.4)
    tgt_boxes = jnp.concatenate([t_cxcy, t_wh], axis=-1).astype(jnp.float32)

    losses = set_criterion_forward(pred_logits, pred_boxes, tgt_labels, tgt_boxes, C)
    losses = jax.tree_util.tree_map(jax.block_until_ready, losses)
    print("KERNEL_OK")
</pallas_src>

<mosaic_0001>
module attributes {stable_mosaic.version = 11 : i64} {
  func.func @_matcher_cost_kernel(%arg0: i32, %arg1: memref<1x8x128xf32, #tpu.memory_space<vmem>>, %arg2: memref<1x8x4xf32, #tpu.memory_space<vmem>>, %arg3: memref<1x1x128xi32, #tpu.memory_space<vmem>>, %arg4: memref<1x4x128xf32, #tpu.memory_space<vmem>>, %arg5: memref<1x8x128xf32, #tpu.memory_space<vmem>>) attributes {dimension_semantics = [#tpu.dimension_semantics<parallel>], iteration_bounds = array<i64: 2>, scalar_prefetch = 0 : i64, scratch_operands = 0 : i64, tpu.core_type = #tpu.core_type<tc>, window_params = [{transform_indices = @transform_0, window_bounds = array<i64: 1, 8, 128>}, {transform_indices = @transform_1, window_bounds = array<i64: 1, 8, 4>}, {transform_indices = @transform_2, window_bounds = array<i64: 1, 1, 128>}, {transform_indices = @transform_3, window_bounds = array<i64: 1, 4, 128>}, {transform_indices = @transform_4, window_bounds = array<i64: 1, 8, 128>}]} {
    %c0 = arith.constant 0 : index
    %c0_0 = arith.constant 0 : index
    %c0_1 = arith.constant 0 : index
    %0 = vector.load %arg1[%c0, %c0_0, %c0_1] : memref<1x8x128xf32, #tpu.memory_space<vmem>>, vector<1x8x128xf32>
    %1 = arith.negf %0 : vector<1x8x128xf32>
    %2 = math.exp %1 : vector<1x8x128xf32>
    %cst = arith.constant 1.000000e+00 : f32
    %3 = vector.broadcast %cst : f32 to vector<1x8x128xf32>
    %4 = arith.addf %3, %2 : vector<1x8x128xf32>
    %5 = arith.divf %3, %4 : vector<1x8x128xf32>
    %cst_2 = arith.constant 0.000000e+00 : f32
    %6 = vector.broadcast %cst_2 : f32 to vector<1x8x128xf32>
    %7 = arith.maximumf %0, %6 : vector<1x8x128xf32>
    %8 = math.absf %0 : vector<1x8x128xf32>
    %cst_3 = arith.constant 0.000000e+00 : f32
    %9 = vector.broadcast %cst_3 : f32 to vector<1x8x128xf32>
    %10 = arith.subf %9, %8 : vector<1x8x128xf32>
    %11 = math.exp %10 : vector<1x8x128xf32>
    %cst_4 = arith.constant 1.000000e+00 : f32
    %12 = vector.broadcast %cst_4 : f32 to vector<1x8x128xf32>
    %13 = arith.addf %12, %11 : vector<1x8x128xf32>
    %14 = math.log %13 : vector<1x8x128xf32>
    %15 = arith.addf %7, %14 : vector<1x8x128xf32>
    %cst_5 = arith.constant 0.000000e+00 : f32
    %16 = vector.broadcast %cst_5 : f32 to vector<1x8x128xf32>
    %17 = arith.subf %16, %0 : vector<1x8x128xf32>
    %cst_6 = arith.constant 0.000000e+00 : f32
    %18 = vector.broadcast %cst_6 : f32 to vector<1x8x128xf32>
    %19 = arith.maximumf %17, %18 : vector<1x8x128xf32>
    %20 = math.absf %17 : vector<1x8x128xf32>
    %cst_7 = arith.constant 0.000000e+00 : f32
    %21 = vector.broadcast %cst_7 : f32 to vector<1x8x128xf32>
    %22 = arith.subf %21, %20 : vector<1x8x128xf32>
    %23 = math.exp %22 : vector<1x8x128xf32>
    %cst_8 = arith.constant 1.000000e+00 : f32
    %24 = vector.broadcast %cst_8 : f32 to vector<1x8x128xf32>
    %25 = arith.addf %24, %23 : vector<1x8x128xf32>
    %26 = math.log %25 : vector<1x8x128xf32>
    %27 = arith.addf %19, %26 : vector<1x8x128xf32>
    %cst_9 = arith.constant 1.000000e+00 : f32
    %28 = vector.broadcast %cst_9 : f32 to vector<1x8x128xf32>
    %29 = arith.subf %28, %5 : vector<1x8x128xf32>
    %30 = arith.mulf %5, %5 : vector<1x8x128xf32>
    %cst_10 = arith.constant 7.500000e-01 : f32
    %31 = vector.broadcast %cst_10 : f32 to vector<1x8x128xf32>
    %32 = arith.mulf %31, %30 : vector<1x8x128xf32>
    %33 = arith.mulf %32, %15 : vector<1x8x128xf32>
    %34 = arith.mulf %29, %29 : vector<1x8x128xf32>
    %cst_11 = arith.constant 2.500000e-01 : f32
    %35 = vector.broadcast %cst_11 : f32 to vector<1x8x128xf32>
    %36 = arith.mulf %35, %34 : vector<1x8x128xf32>
    %37 = arith.mulf %36, %27 : vector<1x8x128xf32>
    %38 = arith.subf %37, %33 : vector<1x8x128xf32>
    %39 = arith.truncf %38 : vector<1x8x128xf32> to vector<1x8x128xbf16>
    %c0_12 = arith.constant 0 : index
    %c0_13 = arith.constant 0 : index
    %c0_14 = arith.constant 0 : index
    %40 = vector.load %arg3[%c0_12, %c0_13, %c0_14] : memref<1x1x128xi32, #tpu.memory_space<vmem>>, vector<1x1x128xi32>
    %41 = tpu.iota {dimensions = array<i32: 1>} : vector<1x128x128xi32>
    %42 = vector.broadcast %40 : vector<1x1x128xi32> to vector<1x128x128xi32>
    %43 = arith.cmpi eq, %41, %42 : vector<1x128x128xi32>
    %44 = arith.extui %43 : vector<1x128x128xi1> to vector<1x128x128xi32>
    %45 = arith.sitofp %44 : vector<1x128x128xi32> to vector<1x128x128xf32>
    %46 = arith.truncf %45 : vector<1x128x128xf32> to vector<1x128x128xbf16>
    "tpu.trace_start"() <{level = 10 : i32, message = "bqc,bct->bqt"}> : () -> ()
    %cst_15 = arith.constant dense<0.000000e+00> : vector<1x8x128xf32>
    %47 = tpu.matmul %39, %46, %cst_15 {dimension_numbers = #tpu.dot_dimension_numbers<[2], [1], [1], [2], [0, 0, 0, 1, 1, 2], [0], [0]>} : vector<1x8x128xbf16>, vector<1x128x128xbf16>, vector<1x8x128xf32> -> vector<1x8x128xf32>
    "tpu.trace_stop"() : () -> ()
    %c0_16 = arith.constant 0 : index
    %c0_17 = arith.constant 0 : index
    %c0_18 = arith.constant 0 : index
    %48 = vector.load %arg2[%c0_16, %c0_17, %c0_18] : memref<1x8x4xf32, #tpu.memory_space<vmem>>, vector<1x8x4xf32>
    %c0_19 = arith.constant 0 : index
    %c0_20 = arith.constant 0 : index
    %c0_21 = arith.constant 0 : index
    %49 = vector.load %arg4[%c0_19, %c0_20, %c0_21] : memref<1x4x128xf32, #tpu.memory_space<vmem>>, vector<1x4x128xf32>
    %cst_22 = arith.constant 0.000000e+00 : f32
    %50 = vector.broadcast %cst_22 : f32 to vector<1x8x128xf32>
    %51 = vector.extract_strided_slice %48 {offsets = [0, 0, 0], sizes = [1, 8, 1], strides = [1, 1, 1]} : vector<1x8x4xf32> to vector<1x8x1xf32>
    %52 = vector.shape_cast %51 : vector<1x8x1xf32> to vector<1x8x1xf32>
    %53 = vector.broadcast %52 : vector<1x8x1xf32> to vector<1x8x128xf32>
    %54 = vector.extract_strided_slice %49 {offsets = [0, 0, 0], sizes = [1, 1, 128], strides = [1, 1, 1]} : vector<1x4x128xf32> to vector<1x1x128xf32>
    %55 = vector.shape_cast %54 : vector<1x1x128xf32> to vector<1x1x128xf32>
    %56 = vector.broadcast %55 : vector<1x1x128xf32> to vector<1x8x128xf32>
    %57 = arith.subf %53, %56 : vector<1x8x128xf32>
    %58 = math.absf %57 : vector<1x8x128xf32>
    %59 = arith.addf %50, %58 : vector<1x8x128xf32>
    %60 = vector.extract_strided_slice %48 {offsets = [0, 0, 1], sizes = [1, 8, 1], strides = [1, 1, 1]} : vector<1x8x4xf32> to vector<1x8x1xf32>
    %61 = vector.shape_cast %60 : vector<1x8x1xf32> to vector<1x8x1xf32>
    %62 = vector.broadcast %61 : vector<1x8x1xf32> to vector<1x8x128xf32>
    %63 = vector.extract_strided_slice %49 {offsets = [0, 1, 0], sizes = [1, 1, 128], strides = [1, 1, 1]} : vector<1x4x128xf32> to vector<1x1x128xf32>
    %64 = vector.shape_cast %63 : vector<1x1x128xf32> to vector<1x1x128xf32>
    %65 = vector.broadcast %64 : vector<1x1x128xf32> to vector<1x8x128xf32>
    %66 = arith.subf %62, %65 : vector<1x8x128xf32>
    %67 = math.absf %66 : vector<1x8x128xf32>
    %68 = arith.addf %59, %67 : vector<1x8x128xf32>
    %69 = vector.extract_strided_slice %48 {offsets = [0, 0, 2], sizes = [1, 8, 1], strides = [1, 1, 1]} : vector<1x8x4xf32> to vector<1x8x1xf32>
    %70 = vector.shape_cast %69 : vector<1x8x1xf32> to vector<1x8x1xf32>
    %71 = vector.broadcast %70 : vector<1x8x1xf32> to vector<1x8x128xf32>
    %72 = vector.extract_strided_slice %49 {offsets = [0, 2, 0], sizes = [1, 1, 128], strides = [1, 1, 1]} : vector<1x4x128xf32> to vector<1x1x128xf32>
    %73 = vector.shape_cast %72 : vector<1x1x128xf32> to vector<1x1x128xf32>
    %74 = vector.broadcast %73 : vector<1x1x128xf32> to vector<1x8x128xf32>
    %75 = arith.subf %71, %74 : vector<1x8x128xf32>
    %76 = math.absf %75 : vector<1x8x128xf32>
    %77 = arith.addf %68, %76 : vector<1x8x128xf32>
    %78 = vector.extract_strided_slice %48 {offsets = [0, 0, 3], sizes = [1, 8, 1], strides = [1, 1, 1]} : vector<1x8x4xf32> to vector<1x8x1xf32>
    %79 = vector.shape_cast %78 : vector<1x8x1xf32> to vector<1x8x1xf32>
    %80 = vector.broadcast %79 : vector<1x8x1xf32> to vector<1x8x128xf32>
    %81 = vector.extract_strided_slice %49 {offsets = [0, 3, 0], sizes = [1, 1, 128], strides = [1, 1, 1]} : vector<1x4x128xf32> to vector<1x1x128xf32>
    %82 = vector.shape_cast %81 : vector<1x1x128xf32> to vector<1x1x128xf32>
    %83 = vector.broadcast %82 : vector<1x1x128xf32> to vector<1x8x128xf32>
    %84 = arith.subf %80, %83 : vector<1x8x128xf32>
    %85 = math.absf %84 : vector<1x8x128xf32>
    %86 = arith.addf %77, %85 : vector<1x8x128xf32>
    %87 = vector.extract_strided_slice %48 {offsets = [0, 0, 0], sizes = [1, 8, 1], strides = [1, 1, 1]} : vector<1x8x4xf32> to vector<1x8x1xf32>
    %88 = vector.extract_strided_slice %48 {offsets = [0, 0, 2], sizes = [1, 8, 1], strides = [1, 1, 1]} : vector<1x8x4xf32> to vector<1x8x1xf32>
    %cst_23 = arith.constant 5.000000e-01 : f32
    %89 = vector.broadcast %cst_23 : f32 to vector<1x8x1xf32>
    %90 = arith.mulf %89, %88 : vector<1x8x1xf32>
    %91 = arith.subf %87, %90 : vector<1x8x1xf32>
    %92 = vector.shape_cast %91 : vector<1x8x1xf32> to vector<1x8x1xf32>
    %93 = vector.broadcast %92 : vector<1x8x1xf32> to vector<1x8x128xf32>
    %94 = vector.extract_strided_slice %48 {offsets = [0, 0, 1], sizes = [1, 8, 1], strides = [1, 1, 1]} : vector<1x8x4xf32> to vector<1x8x1xf32>
    %95 = vector.extract_strided_slice %48 {offsets = [0, 0, 3], sizes = [1, 8, 1], strides = [1, 1, 1]} : vector<1x8x4xf32> to vector<1x8x1xf32>
    %cst_24 = arith.constant 5.000000e-01 : f32
    %96 = vector.broadcast %cst_24 : f32 to vector<1x8x1xf32>
    %97 = arith.mulf %96, %95 : vector<1x8x1xf32>
    %98 = arith.subf %94, %97 : vector<1x8x1xf32>
    %99 = vector.shape_cast %98 : vector<1x8x1xf32> to vector<1x8x1xf32>
    %100 = vector.broadcast %99 : vector<1x8x1xf32> to vector<1x8x128xf32>
    %101 = vector.extract_strided_slice %48 {offsets = [0, 0, 0], sizes = [1, 8, 1], strides = [1, 1, 1]} : vector<1x8x4xf32> to vector<1x8x1xf32>
    %102 = vector.extract_strided_slice %48 {offsets = [0, 0, 2], sizes = [1, 8, 1], strides = [1, 1, 1]} : vector<1x8x4xf32> to vector<1x8x1xf32>
    %cst_25 = arith.constant 5.000000e-01 : f32
    %103 = vector.broadcast %cst_25 : f32 to vector<1x8x1xf32>
    %104 = arith.mulf %103, %102 : vector<1x8x1xf32>
    %105 = arith.addf %101, %104 : vector<1x8x1xf32>
    %106 = vector.shape_cast %105 : vector<1x8x1xf32> to vector<1x8x1xf32>
    %107 = vector.broadcast %106 : vector<1x8x1xf32> to vector<1x8x128xf32>
    %108 = vector.extract_strided_slice %48 {offsets = [0, 0, 1], sizes = [1, 8, 1], strides = [1, 1, 1]} : vector<1x8x4xf32> to vector<1x8x1xf32>
    %109 = vector.extract_strided_slice %48 {offsets = [0, 0, 3], sizes = [1, 8, 1], strides = [1, 1, 1]} : vector<1x8x4xf32> to vector<1x8x1xf32>
    %cst_26 = arith.constant 5.000000e-01 : f32
    %110 = vector.broadcast %cst_26 : f32 to vector<1x8x1xf32>
    %111 = arith.mulf %110, %109 : vector<1x8x1xf32>
    %112 = arith.addf %108, %111 : vector<1x8x1xf32>
    %113 = vector.shape_cast %112 : vector<1x8x1xf32> to vector<1x8x1xf32>
    %114 = vector.broadcast %113 : vector<1x8x1xf32> to vector<1x8x128xf32>
    %115 = vector.extract_strided_slice %49 {offsets = [0, 0, 0], sizes = [1, 1, 128], strides = [1, 1, 1]} : vector<1x4x128xf32> to vector<1x1x128xf32>
    %116 = vector.extract_strided_slice %49 {offsets = [0, 2, 0], sizes = [1, 1, 128], strides = [1, 1, 1]} : vector<1x4x128xf32> to vector<1x1x128xf32>
    %cst_27 = arith.constant 5.000000e-01 : f32
    %117 = vector.broadcast %cst_27 : f32 to vector<1x1x128xf32>
    %118 = arith.mulf %117, %116 : vector<1x1x128xf32>
    %119 = arith.subf %115, %118 : vector<1x1x128xf32>
    %120 = vector.shape_cast %119 : vector<1x1x128xf32> to vector<1x1x128xf32>
    %121 = vector.broadcast %120 : vector<1x1x128xf32> to vector<1x8x128xf32>
    %122 = vector.extract_strided_slice %49 {offsets = [0, 1, 0], sizes = [1, 1, 128], strides = [1, 1, 1]} : vector<1x4x128xf32> to vector<1x1x128xf32>
    %123 = vector.extract_strided_slice %49 {offsets = [0, 3, 0], sizes = [1, 1, 128], strides = [1, 1, 1]} : vector<1x4x128xf32> to vector<1x1x128xf32>
    %cst_28 = arith.constant 5.000000e-01 : f32
    %124 = vector.broadcast %cst_28 : f32 to vector<1x1x128xf32>
    %125 = arith.mulf %124, %123 : vector<1x1x128xf32>
    %126 = arith.subf %122, %125 : vector<1x1x128xf32>
    %127 = vector.shape_cast %126 : vector<1x1x128xf32> to vector<1x1x128xf32>
    %128 = vector.broadcast %127 : vector<1x1x128xf32> to vector<1x8x128xf32>
    %129 = vector.extract_strided_slice %49 {offsets = [0, 0, 0], sizes = [1, 1, 128], strides = [1, 1, 1]} : vector<1x4x128xf32> to vector<1x1x128xf32>
    %130 = vector.extract_strided_slice %49 {offsets = [0, 2, 0], sizes = [1, 1, 128], strides = [1, 1, 1]} : vector<1x4x128xf32> to vector<1x1x128xf32>
    %cst_29 = arith.constant 5.000000e-01 : f32
    %131 = vector.broadcast %cst_29 : f32 to vector<1x1x128xf32>
    %132 = arith.mulf %131, %130 : vector<1x1x128xf32>
    %133 = arith.addf %129, %132 : vector<1x1x128xf32>
    %134 = vector.shape_cast %133 : vector<1x1x128xf32> to vector<1x1x128xf32>
    %135 = vector.broadcast %134 : vector<1x1x128xf32> to vector<1x8x128xf32>
    %136 = vector.extract_strided_slice %49 {offsets = [0, 1, 0], sizes = [1, 1, 128], strides = [1, 1, 1]} : vector<1x4x128xf32> to vector<1x1x128xf32>
    %137 = vector.extract_strided_slice %49 {offsets = [0, 3, 0], sizes = [1, 1, 128], strides = [1, 1, 1]} : vector<1x4x128xf32> to vector<1x1x128xf32>
    %cst_30 = arith.constant 5.000000e-01 : f32
    %138 = vector.broadcast %cst_30 : f32 to vector<1x1x128xf32>
    %139 = arith.mulf %138, %137 : vector<1x1x128xf32>
    %140 = arith.addf %136, %139 : vector<1x1x128xf32>
    %141 = vector.shape_cast %140 : vector<1x1x128xf32> to vector<1x1x128xf32>
    %142 = vector.broadcast %141 : vector<1x1x128xf32> to vector<1x8x128xf32>
    %143 = arith.subf %107, %93 : vector<1x8x128xf32>
    %144 = arith.subf %114, %100 : vector<1x8x128xf32>
    %145 = arith.mulf %143, %144 : vector<1x8x128xf32>
    %146 = arith.subf %135, %121 : vector<1x8x128xf32>
    %147 = arith.subf %142, %128 : vector<1x8x128xf32>
    %148 = arith.mulf %146, %147 : vector<1x8x128xf32>
    %149 = arith.minimumf %107, %135 : vector<1x8x128xf32>
    %150 = arith.maximumf %93, %121 : vector<1x8x128xf32>
    %151 = arith.subf %149, %150 : vector<1x8x128xf32>
    %cst_31 = arith.constant 0.000000e+00 : f32
    %152 = vector.broadcast %cst_31 : f32 to vector<1x8x128xf32>
    %153 = arith.maximumf %151, %152 : vector<1x8x128xf32>
    %154 = arith.minimumf %114, %142 : vector<1x8x128xf32>
    %155 = arith.maximumf %100, %128 : vector<1x8x128xf32>
    %156 = arith.subf %154, %155 : vector<1x8x128xf32>
    %cst_32 = arith.constant 0.000000e+00 : f32
    %157 = vector.broadcast %cst_32 : f32 to vector<1x8x128xf32>
    %158 = arith.maximumf %156, %157 : vector<1x8x128xf32>
    %159 = arith.mulf %153, %158 : vector<1x8x128xf32>
    %160 = arith.addf %145, %148 : vector<1x8x128xf32>
    %161 = arith.subf %160, %159 : vector<1x8x128xf32>
    %cst_33 = arith.constant 9.99999993E-9 : f32
    %162 = vector.broadcast %cst_33 : f32 to vector<1x8x128xf32>
    %163 = arith.addf %161, %162 : vector<1x8x128xf32>
    %164 = tpu.reciprocal %163 {approx = true} : vector<1x8x128xf32> -> vector<1x8x128xf32>
    %165 = arith.mulf %159, %164 : vector<1x8x128xf32>
    %166 = arith.maximumf %107, %135 : vector<1x8x128xf32>
    %167 = arith.minimumf %93, %121 : vector<1x8x128xf32>
    %168 = arith.subf %166, %167 : vector<1x8x128xf32>
    %169 = arith.maximumf %114, %142 : vector<1x8x128xf32>
    %170 = arith.minimumf %100, %128 : vector<1x8x128xf32>
    %171 = arith.subf %169, %170 : vector<1x8x128xf32>
    %172 = arith.mulf %168, %171 : vector<1x8x128xf32>
    %173 = arith.subf %172, %161 : vector<1x8x128xf32>
    %cst_34 = arith.constant 9.99999993E-9 : f32
    %174 = vector.broadcast %cst_34 : f32 to vector<1x8x128xf32>
    %175 = arith.addf %172, %174 : vector<1x8x128xf32>
    %176 = tpu.reciprocal %175 {approx = true} : vector<1x8x128xf32> -> vector<1x8x128xf32>
    %177 = arith.mulf %173, %176 : vector<1x8x128xf32>
    %178 = arith.subf %165, %177 : vector<1x8x128xf32>
    %cst_35 = arith.constant 5.000000e+00 : f32
    %179 = vector.broadcast %cst_35 : f32 to vector<1x8x128xf32>
    %180 = arith.mulf %179, %86 : vector<1x8x128xf32>
    %cst_36 = arith.constant 2.000000e+00 : f32
    %181 = vector.broadcast %cst_36 : f32 to vector<1x8x128xf32>
    %182 = arith.mulf %181, %47 : vector<1x8x128xf32>
    %183 = arith.addf %180, %182 : vector<1x8x128xf32>
    %cst_37 = arith.constant 0.000000e+00 : f32
    %184 = vector.broadcast %cst_37 : f32 to vector<1x8x128xf32>
    %185 = arith.subf %184, %178 : vector<1x8x128xf32>
    %cst_38 = arith.constant 2.000000e+00 : f32
    %186 = vector.broadcast %cst_38 : f32 to vector<1x8x128xf32>
    %187 = arith.mulf %186, %185 : vector<1x8x128xf32>
    %188 = arith.addf %183, %187 : vector<1x8x128xf32>
    %c0_39 = arith.constant 0 : index
    %c0_40 = arith.constant 0 : index
    %c0_41 = arith.constant 0 : index
    %189 = vector.load %arg5[%c0_39, %c0_40, %c0_41] : memref<1x8x128xf32, #tpu.memory_space<vmem>>, vector<1x8x128xf32>
    tpu.vector_store %arg5[%c0_39, %c0_40, %c0_41], %188 {strides = array<i32>} : memref<1x8x128xf32, #tpu.memory_space<vmem>>, vector<1x8x128xf32>,
    return
  }
  func.func @transform_0(%arg0: i32) -> (i32, i32, i32) {
    %c0_i32 = arith.constant 0 : i32
    %c0_i32_0 = arith.constant 0 : i32
    %c0_i32_1 = arith.constant 0 : i32
    return %arg0, %c0_i32, %c0_i32_0 : i32, i32, i32
  }
  func.func @transform_1(%arg0: i32) -> (i32, i32, i32) {
    %c0_i32 = arith.constant 0 : i32
    %c0_i32_0 = arith.constant 0 : i32
    %c0_i32_1 = arith.constant 0 : i32
    return %arg0, %c0_i32, %c0_i32_0 : i32, i32, i32
  }
  func.func @transform_2(%arg0: i32) -> (i32, i32, i32) {
    %c0_i32 = arith.constant 0 : i32
    %c0_i32_0 = arith.constant 0 : i32
    %c0_i32_1 = arith.constant 0 : i32
    return %arg0, %c0_i32, %c0_i32_0 : i32, i32, i32
  }
  func.func @transform_3(%arg0: i32) -> (i32, i32, i32) {
    %c0_i32 = arith.constant 0 : i32
    %c0_i32_0 = arith.constant 0 : i32
    %c0_i32_1 = arith.constant 0 : i32
    return %arg0, %c0_i32, %c0_i32_0 : i32, i32, i32
  }
  func.func @transform_4(%arg0: i32) -> (i32, i32, i32) {
    %c0_i32 = arith.constant 0 : i32
    %c0_i32_0 = arith.constant 0 : i32
    %c0_i32_1 = arith.constant 0 : i32
    return %arg0, %c0_i32, %c0_i32_0 : i32, i32, i32
  }
}

</mosaic_0001>

<bundles_post_ra>
// kernel: tpu_custom_call.1
= control target key start
LH: loop header
LB: loop body
LE: loop exit
PB: predicated region body
PF: predicated region fallthrough
CT: control target
= control target key end

     0   :  { %9 = vsyncpa [#allocation3], 0  ;;  %s1068_s0 = inlined_call_operand.vmem [shape: f32[2,8,128], index: 0, kind: input, shape index: {}]   ;;  %s1069_s1 = inlined_call_operand.vmem [shape: f32[2,8,4], index: 1, kind: input, shape index: {}]   ;;  %s1070_s2 = inlined_call_operand.vmem [shape: s32[2,1,128], index: 2, kind: input, shape index: {}]   ;;  %s1071_s3 = inlined_call_operand.vmem [shape: f32[2,4,128], index: 3, kind: input, shape index: {}]   ;;  %s1072_s4 = inlined_call_operand.hbm [shape: f32[2,8,128], index: 4, kind: output, shape index: {}]  }
   0x1   :  { %11 = vsyncpa [#allocation3 + $0x1], 0  ;;  %s877_s15 = smov 0   ;;  %s879_s16 = smov 0  }
   0x2   :  { %s881_s17 = smov 0   ;;  %s883_s18 = smov 0  }
   0x3 LB: > { %s898_s19 = sadd.s32 4294967295, %s841_s18   ;;  %s634_s20 = sadd.s32 4294967294, %s841_s18   ;;  %s841_s18 = sphi %s883_s18, %s1078_s18   ;;  %s837_s17 = sphi %s881_s17, %s1077_s17   ;;  %s833_s16 = sphi %s879_s16, %s1076_s16   ;;  %s829_s15 = sphi %s877_s15, %s1075_s15  }
   0x4   : > { %s902_s21 = sadd.s32 1, %s841_s18   ;;  %s128_s22 = sadd.s32 1, %s837_s17 }
   0x5   : > { %s125_s23 = ssub.s32 %s841_s18, %s902_s21  ;;  %p138_p0 = scmp.ne.s32.totalorder %s837_s17, %s833_s16 }
   0x6   : > { %p126_p1 = scmp.eq.s32.totalorder %s125_s23, 0  ;;  %p139_p2 = scmp.eq.s32.totalorder %s898_s19, 1 }
   0x7   : > { %p144_p3 = scmp.ne.s32.totalorder %s833_s16, %s829_s15  ;;  %p145_p4 = scmp.eq.s32.totalorder %s634_s20, 1 }
   0x8   : > { %s913_s24 = scalar_select %p126_p1, %s837_s17, %s128_s22  }
   0x9   : > { %p915_p5 = por %p139_p2, %p138_p0  ;;  %p919_p6 = por %p145_p4, %p144_p3 }
   0xa   : > { %p637_p7 = scmp.ge.s32.totalorder %s841_s18, 1  ;;  %p190_p8 = scmp.lt.s32.totalorder %s841_s18, 3 }
   0xc   : > { %p191_p9 = pnand %p637_p7, %p190_p8 }
   0xd   : > { %p226_p10 = scmp.lt.s32.totalorder (!%p191_p9), %s898_s19, 1  ;;  %v278_v0 = vlaneseq (!%p191_p9)  ;;  %v843_v1 = vmov (!%p191_p9), 0.0   ;;  %vm844_vm0 = vmmov (!%p191_p9), 0   ;;  %v845_v3 = vmov (!%p191_p9), 1   ;;  %s848_s12 = smov (!%p191_p9), 126  }
   0xe   : > { %194 = sbr.rel (%p191_p9) target bundleno = 330 (0x14a), region = 36  ;;  %689 = vmatprep.subr.bf16.mxu0 (!%p191_p9), %v843_v1  ;;  %705 = vmatprep.mubr.msk.bf16.mxu0 (!%p191_p9), %vm844_vm0, %v843_v1  ;;  %v846_v4 = vmov (!%p191_p9), 0   ;;  %v847_v13 = vmov (!%p191_p9), 1.0|1.0   ;;  %v849_v60 = vmov (!%p191_p9), 2   ;;  %v850_v61 = vmov (!%p191_p9), 3  }
   0xf   : > { %v931_v2 = vshrl.u32 (!%p191_p9), %v278_v0, 7  ;;  %757 = vset.pattern.permute.xlu1 (!%p191_p9), %v845_v3  ;;  %756 = vset.pattern.permute.xlu0 (!%p191_p9), %v846_v4  ;;  %s223_s23 = sand.u32 (!%p191_p9), 1, %s833_s16  }
  0x11   : > { %v280_v5 = vadd.s32 (!%p191_p9), 8, %v931_v2  ;;  %v281_v6 = vadd.s32 (!%p191_p9), 16, %v931_v2  ;;  %v282_v7 = vadd.s32 (!%p191_p9), 24, %v931_v2  ;;  %v283_v9 = vadd.s32 (!%p191_p9), 32, %v931_v2 }
  0x12   : > { %v284_v10 = vadd.s32 (!%p191_p9), 40, %v931_v2  ;;  %v285_v14 = vadd.s32 (!%p191_p9), 48, %v931_v2  ;;  %v286_v16 = vadd.s32 (!%p191_p9), 56, %v931_v2  ;;  %v287_v19 = vadd.s32 (!%p191_p9), 64, %v931_v2 }
  0x13   : > { %v288_v21 = vadd.s32 (!%p191_p9), 72, %v931_v2  ;;  %v289_v26 = vadd.s32 (!%p191_p9), 80, %v931_v2  ;;  %v290_v27 = vadd.s32 (!%p191_p9), 88, %v931_v2  ;;  %v291_v30 = vadd.s32 (!%p191_p9), 96, %v931_v2 }
  0x14   : > { %v292_v31 = vadd.s32 (!%p191_p9), 104, %v931_v2  ;;  %v293_v33 = vadd.s32 (!%p191_p9), 112, %v931_v2  ;;  %v294_v34 = vadd.s32 (!%p191_p9), 120, %v931_v2 }
  0x15   : > { %s929_s27 = scalar_select %p226_p10, %s898_s19, 1 }
  0x17   : > { %s639_s28 = sshll.u32 %s929_s27, 3  ;;  %s236_s5 = scalar_lea.vmem %s1070_s2, %s929_s27 }
  0x18   : > { %s233_s8 = scalar_lea.vmem %s1069_s1, %s639_s28  ;;  %v946_v8 = vld [vmem:[%s236_s5] ss:$0 sm:$0xff]  ;;  %s229_s11 = scalar_lea.vmem %s1068_s0, %s639_s28 }
  0x19   : > { %v950_v11 = vld [vmem:[%s233_s8] sm:$0xff]  ;;  %vm299_vm1 = vcmp.eq.s32.totalorder %v931_v2, %v946_v8  ;;  %vm300_vm2 = vcmp.eq.s32.totalorder %v280_v5, %v946_v8  ;;  %vm301_vm3 = vcmp.eq.s32.totalorder %v281_v6, %v946_v8  ;;  %vm302_vm4 = vcmp.eq.s32.totalorder %v282_v7, %v946_v8  ;;  %s641_s13 = sshll.u32 %s929_s27, 2  ;;  %s638_s27 = sshll.u32 %s223_s23, 3 }
  0x1a   : > { %v442_v12 = vmul.f32 0.5, %v950_v11  ;;  %vm660_vm5 = vmpackc.low %vm300_vm2, %vm299_vm1  ;;  %v964_v15 = vld [vmem:[%s229_s11] sm:$0xff]  ;;  %vm303_vm7 = vcmp.eq.s32.totalorder %v283_v9, %v946_v8  ;;  %vm304_vm8 = vcmp.eq.s32.totalorder %v284_v10, %v946_v8  ;;  %vm305_vm10 = vcmp.eq.s32.totalorder %v285_v14, %v946_v8  ;;  %s240_s22 = scalar_lea.vmem %s1071_s3, %s641_s13  ;;  %s677_s28 = sshll.u32 %s898_s19, 7 }
  0x1b   : > { %690 = vmatpush3.bf16.msk.msra.mxu0 %vm660_vm5, %v847_v13  ;;  %vm662_vm6 = vmpackc.low %vm302_vm4, %vm301_vm3  ;;  %v642_v17 = vmul.f32 -1.442695, %v964_v15  ;;  %v250_v18 = vand.u32 2147483647, %v964_v15  ;;  %v258_v20 = vsub.f32 0.0, %v964_v15  ;;  %vm306_vm11 = vcmp.eq.s32.totalorder %v286_v16, %v946_v8  ;;  %s225_s29 = scalar_lea.vmem [#allocation2], %s638_s27  ;;  %s1026_s7 = scalar_lea.hbm %s1072_s4, %s677_s28 }
  0x1c   : > { %444 = vrot.lane.b32.xlu0 %v442_v12, %s848_s12  ;;  %691 = vmatprep.subr.bf16.mxu0 %v843_v1  ;;  %vm664_vm9 = vmpackc.low %vm304_vm8, %vm303_vm7  ;;  %vm307_vm13 = vcmp.eq.s32.totalorder %v287_v19, %v946_v8  ;;  %vm308_vm14 = vcmp.eq.s32.totalorder %v288_v21, %v946_v8  ;;  %vm309_vm0 = vcmp.eq.s32.totalorder %v289_v26, %v946_v8  ;;  %v249_v42 = vmax.f32 %v964_v15, 0.0  ;;  %v396_v62 = vld [vmem:[%s240_s22] sm:$0xf]  ;;  %s542_s30 = sshll.u32 %s225_s29, 4  ;;  %s529_s8 = scalar_lea.sflag [#allocation3], %s223_s23  ;;  %s1028_s30 = int_to_ptr.vmem [resolvable:$true] %s542_s30 }
  0x1d   : > { %763 = vpow2.f32 %v642_v17  ;;  %v251_v22 = vsub.f32 0.0, %v250_v18  ;;  %v260_v23 = vand.u32 2147483647, %v258_v20  ;;  %vm666_vm12 = vmpackc.low %vm306_vm11, %vm305_vm10  ;;  %vm310_vm1 = vcmp.eq.s32.totalorder %v290_v27, %v946_v8  ;;  %s779_s9 = scalar_lea.vmem %s1028_s30, 128  ;;  %s851_s19 = smov [#allocation2]  }
  0x1e   : > { %vm668_vm15 = vmpackc.low %vm308_vm14, %vm307_vm13  ;;  %vm311_vm3 = vcmp.eq.s32.totalorder %v291_v30, %v946_v8  ;;  %vm312_vm4 = vcmp.eq.s32.totalorder %v292_v31, %v946_v8  ;;  %vm314_vm7 = vcmp.eq.s32.totalorder %v294_v34, %v946_v8  ;;  %v259_v46 = vmax.f32 %v258_v20, 0.0  ;;  %p780_p11 = scmp.ne.s32.totalorder %s1028_s30, %s779_s9  ;;  %s783_s10 = sshll.u32 %s851_s19, 4  ;;  %s784_s10 = int_to_ptr.vmem [resolvable:$false] %s783_s10 }
  0x1f   : > { %692 = vmatpush3.bf16.msk.msra.mxu0 %vm662_vm6, %v847_v13  ;;  %v252_v24 = vmul.f32 1.442695, %v251_v22  ;;  %v261_v25 = vsub.f32 0.0, %v260_v23  ;;  %vm670_vm2 = vmpackc.low %vm310_vm1, %vm309_vm0  ;;  %vm313_vm6 = vcmp.eq.s32.totalorder %v293_v33, %v946_v8  ;;  %v467_v63 = vmul.f32 0.5, %v396_v62  ;;  %s785_s11 = scalar_lea.vmem %s784_s10, 256  ;;  %p786_p0 = scmp.lt.s32.totalorder %s1028_s30, %s784_s10 }
  0x20   : > { %693 = vmatprep.subr.bf16.mxu0 %v843_v1  ;;  %vm672_vm5 = vmpackc.low %vm312_vm4, %vm311_vm3  ;;  %v404_v6 = vsub.s32 0, %v931_v2  ;;  %v415_v7 = vsub.s32 1, %v931_v2  ;;  %v426_v10 = vsub.s32 2, %v931_v2  ;;  %p781_p12 = pnand %p780_p11, %p915_p5  ;;  %p787_p1 = scmp.lt.s32.totalorder %s785_s11, %s779_s9 }
  0x21   : > { %765 = vpow2.f32 %v252_v24  ;;  %v262_v28 = vmul.f32 1.442695, %v261_v25  ;;  %vm674_vm8 = vmpackc.low %vm314_vm7, %vm313_vm6  ;;  %v469_v0 = vrot.slane %v467_v63, 2 }
  0x22   : > { %v405_v18 = vrot.slane %v396_v62, %v404_v6  ;;  %v427_v19 = vrot.slane %v396_v62, %v426_v10  ;;  %v416_v22 = vrot.slane %v396_v62, %v415_v7  ;;  %p782_p13 = pneg %p781_p12  ;;  %p788_p2 = por %p787_p1, %p786_p0 }
  0x23   : > { %694 = vmatpush3.bf16.msk.msra.mxu0 %vm664_vm9, %v847_v13  ;;  %767 = vpow2.f32 %v262_v28  ;;  %v471_v5 = vsub.f32 %v396_v62, %v469_v0 }
  0x24   : > { %695 = vmatprep.subr.bf16.mxu0 %v843_v1  ;;  %p789_p3 = pnand %p788_p2, %p782_p13 }
  0x25   : > { %v479_v14 = vrot.slane %v471_v5, %v415_v7 }
  0x27   : > { %696 = vmatpush3.bf16.msk.msra.mxu0 %vm666_vm12, %v847_v13  ;;  %v764_v29 = vpop.eup %763 }
  0x28   : > { %697 = vmatprep.subr.bf16.mxu0 %v843_v1  ;;  %v246_v32 = vadd.f32 1.0, %v764_v29 }
  0x2a   : > { %769 = vrcp.f32 %v246_v32 }
  0x2b   : > { %698 = vmatpush3.bf16.msk.msra.mxu0 %vm668_vm15, %v847_v13  ;;  %v766_v35 = vpop.eup %765 }
  0x2c   : > { %699 = vmatprep.subr.bf16.mxu0 %v843_v1  ;;  %v254_v36 = vadd.f32 1.0, %v766_v35 }
  0x2d   : > { %v768_v37 = vpop.eup %767 }
  0x2e   : > { %771 = vlog2.f32 %v254_v36  ;;  %v264_v38 = vadd.f32 1.0, %v768_v37  ;;  %v437_v36 = vsub.s32 3, %v931_v2 }
  0x2f   : > { %700 = vmatpush3.bf16.msk.msra.mxu0 %vm670_vm2, %v847_v13 }
  0x30   : > { %701 = vmatprep.subr.bf16.mxu0 %v843_v1  ;;  %773 = vlog2.f32 %v264_v38 }
  0x33   : > { %702 = vmatpush3.bf16.msk.msra.mxu0 %vm672_vm5, %v847_v13 }
  0x34   : > { %703 = vmatprep.subr.bf16.mxu0 %v843_v1  ;;  %v770_v39 = vpop.eup %769  ;;  %v480_v1 = vadd.f32 %v469_v0, %v396_v62 }
  0x35   : > { %v268_v40 = vsub.f32 1.0, %v770_v39  ;;  %v269_v41 = vmul.f32 %v770_v39, %v770_v39 }
  0x36   : > { %v484_v8 = vrot.slane %v480_v1, %v404_v6  ;;  %v488_v9 = vrot.slane %v480_v1, %v415_v7 }
  0x37   : > { %704 = vmatpush3.bf16.msk.msra.mxu0 %vm674_vm8, %v847_v13  ;;  %v272_v44 = vmul.f32 %v268_v40, %v268_v40  ;;  %v270_v47 = vmul.f32 0.75, %v269_v41 }
  0x38   : > { %v772_v43 = vpop.eup %771  ;;  %v493_v17 = vsub.f32 %v488_v9, %v479_v14 }
  0x39   : > { %v256_v45 = vmul.f32 0.6931472, %v772_v43  ;;  %v273_v51 = vmul.f32 0.25, %v272_v44 }
  0x3a   : > { %v774_v48 = vpop.eup %773 }
  0x3b   : > { %v257_v49 = vadd.f32 %v256_v45, %v249_v42  ;;  %v266_v50 = vmul.f32 0.6931472, %v774_v48 }
  0x3d   : > { %v267_v52 = vadd.f32 %v266_v50, %v259_v46  ;;  %v271_v53 = vmul.f32 %v270_v47, %v257_v49 }
  0x3f   : > { %v274_v54 = vmul.f32 %v273_v51, %v267_v52  ;;  %v438_v51 = vrot.slane %v396_v62, %v437_v36 }
  0x41   : > { %v275_v55 = vsub.f32 %v274_v54, %v271_v53 }
  0x43   : > { %v276_v56 = vpack.c.bf16 %v275_v55, %v275_v55 }
  0x45   : > { %706 = vmatmul.mubr.bf16.vlgmr.msra.gmra.mrb[0].mxu0 %v276_v56 }
  0x8e   : > { %v445_v57 = vpop.permute.xlu0 %444 }
  0x8f   : > { %v447_v58 = vsub.f32 %v950_v11, %v445_v57  ;;  %v457_v59 = vadd.f32 %v445_v57, %v950_v11 }
  0x91   : > { %454 = vperm.xlu1 %757, %v447_v58   ;;  %450 = vperm.xlu0 %756, %v447_v58  }
  0x95   : > { %758 = vset.pattern.permute.xlu1 %v846_v4  ;;  %399 = vperm.xlu0 %756, %v950_v11  }
  0x96   : > { %460 = vperm.xlu1 %758, %v457_v59  }
  0x99   : > { %760 = vset.pattern.permute.xlu0 %v849_v60 }
  0x9a   : > { %759 = vset.pattern.permute.xlu1 %v845_v3  ;;  %421 = vperm.xlu0 %760, %v950_v11  }
  0x9b   : > { %464 = vperm.xlu1 %759, %v457_v59  }
  0x9e   : > { %762 = vset.pattern.permute.xlu0 %v845_v3 }
  0x9f   : > { %410 = vperm.xlu1 %759, %v950_v11  }
  0xa3   : > { %761 = vset.pattern.permute.xlu1 %v850_v61 }
  0xa4   : > { %432 = vperm.xlu1 %761, %v950_v11   ;;  %v475_v11 = vrot.slane %v471_v5, %v404_v6 }
  0xa6   : > { %v492_v16 = vsub.f32 %v484_v8, %v475_v11 }
  0xa8   : > { %v494_v33 = vmul.f32 %v493_v17, %v492_v16 }
 0x110   : > { %v455_v4 = vpop.permute.xlu1 %454  ;;  %v451_v3 = vpop.permute.xlu0 %450 }
 0x111   : > { %v496_v20 = vmax.f32 %v451_v3, %v475_v11  ;;  %v500_v24 = vmax.f32 %v455_v4, %v479_v14  ;;  %v513_v25 = vmin.f32 %v455_v4, %v479_v14  ;;  %v510_v26 = vmin.f32 %v451_v3, %v475_v11 }
 0x114   : > { %v400_v13 = vpop.permute.xlu0 %399 }
 0x115   : > { %v461_v12 = vpop.permute.xlu1 %460  ;;  %v406_v34 = vsub.f32 %v400_v13, %v405_v18 }
 0x116   : > { %v495_v15 = vmin.f32 %v461_v12, %v484_v8  ;;  %v509_v21 = vmax.f32 %v461_v12, %v484_v8  ;;  %v489_v27 = vsub.f32 %v461_v12, %v451_v3 }
 0x117   : > { %v407_v49 = vand.u32 2147483647, %v406_v34 }
 0x118   : > { %v497_v29 = vsub.f32 %v495_v15, %v496_v20  ;;  %v511_v37 = vsub.f32 %v509_v21, %v510_v26  ;;  %v389_v41 = vpop.f32.mrb[0].mxu0 }
 0x119   : > { %v422_v23 = vpop.permute.xlu0 %421  ;;  %v707_v43 = vpop.f32.mrb[1].mxu0  ;;  %v522_v1 = vmul.f32 2.0, %v389_v41 }
 0x11a   : > { %v465_v28 = vpop.permute.xlu1 %464  ;;  %v428_v35 = vsub.f32 %v422_v23, %v427_v19  ;;  %v498_v44 = vmax.f32 %v497_v29, 0.0  ;;  %v392_v48 = vpop.f32.mrb[2].mxu0 }
 0x11b   : > { %v490_v30 = vsub.f32 %v465_v28, %v455_v4  ;;  %v499_v31 = vmin.f32 %v465_v28, %v488_v9  ;;  %v512_v32 = vmax.f32 %v465_v28, %v488_v9  ;;  %v708_v52 = vpop.f32.mrb[3].mxu0 }
 0x11c   : > { %v429_v50 = vand.u32 2147483647, %v428_v35 }
 0x11d   : > { %v491_v38 = vmul.f32 %v490_v30, %v489_v27  ;;  %v501_v39 = vsub.f32 %v499_v31, %v500_v24  ;;  %v514_v40 = vsub.f32 %v512_v32, %v513_v25 }
 0x11e   : > { %v411_v42 = vpop.permute.xlu1 %410 }
 0x11f   : > { %v502_v45 = vmax.f32 %v501_v39, 0.0  ;;  %v515_v46 = vmul.f32 %v514_v40, %v511_v37  ;;  %v417_v47 = vsub.f32 %v411_v42, %v416_v22  ;;  %v504_v54 = vadd.f32 %v494_v33, %v491_v38 }
 0x121   : > { %v503_v53 = vmul.f32 %v502_v45, %v498_v44  ;;  %v517_v2 = vadd.f32 1e-08, %v515_v46  ;;  %v418_v55 = vand.u32 2147483647, %v417_v47 }
 0x123   : > { %v505_v56 = vsub.f32 %v504_v54, %v503_v53  ;;  %v419_v57 = vadd.f32 %v418_v55, %v407_v49  ;;  %v433_v58 = vpop.permute.xlu1 %432  ;;  %775 = vrcp.f32 %v517_v2 }
 0x124   : > { %v439_v59 = vsub.f32 %v433_v58, %v438_v51 }
 0x125   : > { %v506_v60 = vadd.f32 1e-08, %v505_v56  ;;  %v430_v61 = vadd.f32 %v429_v50, %v419_v57  ;;  %v516_v6 = vsub.f32 %v515_v46, %v505_v56 }
 0x126   : > { %v440_v63 = vand.u32 2147483647, %v439_v59 }
 0x127   : > { %777 = vrcp.f32 %v506_v60 }
 0x128   : > { %v441_v0 = vadd.f32 %v440_v63, %v430_v61 }
 0x12a   : > { %v521_v4 = vmul.f32 5.0, %v441_v0 }
 0x12c   : > { %v523_v62 = vadd.f32 %v522_v1, %v521_v4 }
 0x12d   : > { %v776_v5 = vpop.eup %775 }
 0x12e   : > { %v519_v8 = vmul.f32 %v776_v5, %v516_v6 }
 0x131   : > { %v778_v3 = vpop.eup %777 }
 0x132   : > { %v508_v7 = vmul.f32 %v778_v3, %v503_v53 }
 0x134   : > { %v520_v9 = vsub.f32 %v508_v7, %v519_v8 }
 0x136   : > { %v524_v10 = vsub.f32 0.0, %v520_v9 }
 0x138   : > { %v525_v11 = vmul.f32 2.0, %v524_v10 }
 0x13a   : > { %v526_v12 = vadd.f32 %v525_v11, %v523_v62 }
 0x13c   : > { %527 = vst [vmem:[%s225_s29] sm:$0xff] %v526_v12 }
 0x13d   : > { %792 = shalt.err (!%p789_p3)
}
 0x13e   : > { %s793_s12 = scalar_lea.hbm %s1026_s7, 128  ;;  %s797_s20 = scalar_lea.hbm %s1072_s4, 256 }
 0x13f   : > { %p794_p4 = scmp.ne.s32.totalorder %s1026_s7, %s793_s12  ;;  %p798_p9 = scmp.lt.u32.totalorder %s1026_s7, %s1072_s4 }
 0x140   : > { %p799_p10 = scmp.lt.u32.totalorder %s797_s20, %s793_s12  ;;  %p801_p12 = scmp.lt.u32.totalorder %s793_s12, %s1026_s7 }
 0x141   : > { %p795_p7 = pnand %p794_p4, %p915_p5 }
 0x142   : > { %p800_p11 = por %p799_p10, %p798_p9 }
 0x143   : > { %p796_p8 = pneg %p795_p7 }
 0x144   : > { %p802_p13 = por %p801_p12, %p800_p11 }
 0x146   : > { %p803_p0 = pnand %p802_p13, %p796_p8 }
 0x148   : > { %806 = shalt.err (!%p803_p0)
}
 0x149   : > { %709 = dma.vmem_to_hbm [thread:$0]  (%p915_p5), %s1028_s30, 128, %s1026_s7, %s529_s8  }
 0x14a PF: > { %p715_p1 = scmp.ge.s32.totalorder %s841_s18, 2  ;;  %s554_s27 = sand.u32 1, %s829_s15  }
 0x14b   : > { %s555_s28 = scalar_lea.sflag [#allocation3], %s554_s27 }
 0x14c   : > { %p712_p2 = pnand %p715_p1, %p919_p6 }
 0x14e   : > { %824 = dma.done.wait (!%p712_p2), %s555_s28, 128  }
 0x14f   : > { %826 = vsyncadd (!%p712_p2), %s555_s28, 4294967168  ;;  %p14_p3 = scmp.ge.s32.totalorder %s902_s21, 4   ;;  %s1075_s15 = smov %s833_s16 }
 0x150   : > { %s1076_s16 = smov %s837_s17  ;;  %s1077_s17 = smov %s913_s24 }
 0x151   : > { %s1078_s18 = smov %s902_s21  ;;  %16 = sbr.rel (!%p14_p3) target bundleno = 3 (0x3), region = 80 }
 0x158   :  { %560 = vsyncpa [#allocation3], 1 }
 0x159   :  { %562 = vsyncpa [#allocation3 + $0x1], 1 }

</bundles_post_ra>
